<compile_context>
chip_gen: v6e
topology: v6e:2x2x1
jax: 0.10.0
libtpu: 0.0.40
codegen_flags: <defaults>
</compile_context>

<pallas_src>
import jax
import jax.numpy as jnp
from jax.experimental import pallas as pl
from jax.experimental.pallas import tpu as pltpu


def _make_ffn_kernel(d_valid: int, d_pad: int):
    """Build the FFN kernel; d_valid is the true feature count, d_pad >= d_valid."""
    need_mask = d_pad != d_valid
    inv_d = 1.0 / float(d_valid)

    def kernel(x_ref, gamma_ref, beta_ref, w1_ref, b1_ref, w2_ref, b2_ref,
               o_ref):
        # x_ref: (tm, D_pad) tile of rows (padded lanes/rows are zero).
        x = x_ref[...].astype(jnp.float32)

        # ---- LayerNorm over the *valid* feature lanes (eps = 1e-5, biased var,
        #      matching nn.LayerNorm). Padded lanes of x are zero, so the sum is
        #      already correct; mask the centered values so they don't pollute
        #      the variance. gamma/beta are zero-padded -> padded lanes end up 0.
        mu = jnp.sum(x, axis=-1, keepdims=True) * inv_d
        d = x - mu
        if need_mask:
            lane = jax.lax.broadcasted_iota(jnp.int32, x.shape, dimension=1)
            d = jnp.where(lane < d_valid, d, 0.0)
        var = jnp.sum(d * d, axis=-1, keepdims=True) * inv_d
        xn = d * jax.lax.rsqrt(var + 1e-5)
        xn = xn * gamma_ref[...] + beta_ref[...]

        # ---- Linear 1 (D -> H): bf16 operands on the MXU, f32 accumulation,
        #      then Swish (x * sigmoid(x)) in f32.
        h = jnp.dot(xn.astype(jnp.bfloat16), w1_ref[...],
                    preferred_element_type=jnp.float32)
        h = h + b1_ref[...]
        h = h * jax.nn.sigmoid(h)

        # ---- Linear 2 (H -> D): bf16 operands, f32 accumulation.
        y = jnp.dot(h.astype(jnp.bfloat16), w2_ref[...],
                    preferred_element_type=jnp.float32)
        y = y + b2_ref[...]

        o_ref[...] = y.astype(o_ref.dtype)

    return kernel


def _round_up(n: int, m: int) -> int:
    return ((n + m - 1) // m) * m


def feed_forward_network(x, gamma, beta, w1, b1, w2, b2, *, tm=256,
                         vmem_limit_bytes=64 * 1024 * 1024):
    """x: (B, S, D). Weights stored as (in, out) so the kernel does x @ W."""
    B, S, D = x.shape
    H = w1.shape[1]
    N = B * S

    # Lane-dense feature dims (multiples of 128); row tile a multiple of 8.
    D_pad = _round_up(D, 128)
    H_pad = _round_up(H, 128)
    tm_eff = min(tm, _round_up(N, 8))
    N_pad = _round_up(N, tm_eff)

    f32 = jnp.float32
    x2d = jnp.pad(x.reshape(N, D).astype(f32),
                  ((0, N_pad - N), (0, D_pad - D)))
    gamma2d = jnp.pad(gamma.astype(f32), (0, D_pad - D)).reshape(1, D_pad)
    beta2d = jnp.pad(beta.astype(f32), (0, D_pad - D)).reshape(1, D_pad)
    # Weights streamed / held as bf16 (halves VMEM + HBM traffic).
    w1p = jnp.pad(w1, ((0, D_pad - D), (0, H_pad - H))).astype(jnp.bfloat16)
    w2p = jnp.pad(w2, ((0, H_pad - H), (0, D_pad - D))).astype(jnp.bfloat16)
    b1p = jnp.pad(b1.astype(f32), (0, H_pad - H)).reshape(1, H_pad)
    b2p = jnp.pad(b2.astype(f32), (0, D_pad - D)).reshape(1, D_pad)

    grid = (N_pad // tm_eff,)

    # Constant-index operands (weights, biases, LN params): single-buffered.
    def resident(shape):
        return pl.BlockSpec(shape, lambda i: (0, 0),
                            pipeline_mode=pl.Buffered(1))

    cost = pl.CostEstimate(
        flops=int(4 * N_pad * D_pad * H_pad + 10 * N_pad * D_pad),
        transcendentals=int(N_pad * H_pad),
        bytes_accessed=int(2 * N_pad * D_pad * 4            # x in, y out (f32)
                           + 2 * D_pad * H_pad * 2          # W1, W2 (bf16)
                           + (3 * D_pad + H_pad) * 4),      # gamma/beta/biases
    )

    out2d = pl.pallas_call(
        _make_ffn_kernel(D, D_pad),
        out_shape=jax.ShapeDtypeStruct((N_pad, D_pad), x.dtype),
        grid_spec=pltpu.PrefetchScalarGridSpec(
            num_scalar_prefetch=0,
            grid=grid,
            in_specs=[
                pl.BlockSpec((tm_eff, D_pad), lambda i: (i, 0)),   # x rows
                resident((1, D_pad)),                              # LN gamma
                resident((1, D_pad)),                              # LN beta
                resident((D_pad, H_pad)),                          # W1 (bf16)
                resident((1, H_pad)),                              # b1
                resident((H_pad, D_pad)),                          # W2 (bf16)
                resident((1, D_pad)),                              # b2
            ],
            out_specs=pl.BlockSpec((tm_eff, D_pad), lambda i: (i, 0)),
        ),
        compiler_params=pltpu.CompilerParams(
            dimension_semantics=("parallel",),
            vmem_limit_bytes=vmem_limit_bytes),
        cost_estimate=cost,
    )(x2d, gamma2d, beta2d, w1p, b1p, w2p, b2p)

    return out2d[:N, :D].reshape(B, S, D)


def _reference(x, gamma, beta, w1, b1, w2, b2):
    x32 = x.astype(jnp.float32)
    mu = jnp.mean(x32, axis=-1, keepdims=True)
    var = jnp.mean((x32 - mu) ** 2, axis=-1, keepdims=True)
    xn = (x32 - mu) / jnp.sqrt(var + 1e-5) * gamma + beta
    h = xn @ w1 + b1
    h = h * jax.nn.sigmoid(h)
    return (h @ w2 + b2).astype(x.dtype)


if __name__ == "__main__":
    # Small shapes implied by the module: sequence input (B, S, D).
    encoder_dim = 32
    expansion_factor = 4
    B, S = 2, 8
    D = encoder_dim
    H = encoder_dim * expansion_factor

    key = jax.random.PRNGKey(0)
    kx, kw1, kb1, kw2, kb2 = jax.random.split(key, 5)

    x = jax.random.normal(kx, (B, S, D), dtype=jnp.float32)

    # Deterministic parameter init (PyTorch-Linear-like uniform bounds).
    gamma = jnp.ones((D,), jnp.float32)
    beta = jnp.zeros((D,), jnp.float32)
    lim1 = 1.0 / jnp.sqrt(D)
    w1 = jax.random.uniform(kw1, (D, H), jnp.float32, -lim1, lim1)
    b1 = jax.random.uniform(kb1, (H,), jnp.float32, -lim1, lim1)
    lim2 = 1.0 / jnp.sqrt(H)
    w2 = jax.random.uniform(kw2, (H, D), jnp.float32, -lim2, lim2)
    b2 = jax.random.uniform(kb2, (D,), jnp.float32, -lim2, lim2)

    out = feed_forward_network(x, gamma, beta, w1, b1, w2, b2)
    out = jax.block_until_ready(out)

    ref = _reference(x, gamma, beta, w1, b1, w2, b2)
    assert out.shape == (B, S, D)
    # bf16 matmul operands with f32 accumulation -> loosened tolerance.
    assert jnp.allclose(out, ref, atol=2e-2, rtol=2e-2), (
        float(jnp.max(jnp.abs(out - ref))))

    print("KERNEL_OK")
</pallas_src>

<mosaic_0001>
module attributes {stable_mosaic.version = 11 : i64} {
  func.func @kernel(%arg0: i32, %arg1: memref<16x128xf32, #tpu.memory_space<vmem>>, %arg2: memref<1x128xf32, #tpu.memory_space<vmem>>, %arg3: memref<1x128xf32, #tpu.memory_space<vmem>>, %arg4: memref<128x128xbf16, #tpu.memory_space<vmem>>, %arg5: memref<1x128xf32, #tpu.memory_space<vmem>>, %arg6: memref<128x128xbf16, #tpu.memory_space<vmem>>, %arg7: memref<1x128xf32, #tpu.memory_space<vmem>>, %arg8: memref<16x128xf32, #tpu.memory_space<vmem>>) attributes {dimension_semantics = [#tpu.dimension_semantics<parallel>], iteration_bounds = array<i64: 1>, scalar_prefetch = 0 : i64, scratch_operands = 0 : i64, tpu.core_type = #tpu.core_type<tc>, window_params = [{transform_indices = @transform_0, window_bounds = array<i64: 16, 128>}, {pipeline_mode = #tpu.pipeline_mode<synchronous>, transform_indices = @transform_1, window_bounds = array<i64: 1, 128>}, {pipeline_mode = #tpu.pipeline_mode<synchronous>, transform_indices = @transform_2, window_bounds = array<i64: 1, 128>}, {pipeline_mode = #tpu.pipeline_mode<synchronous>, transform_indices = @transform_3, window_bounds = array<i64: 128, 128>}, {pipeline_mode = #tpu.pipeline_mode<synchronous>, transform_indices = @transform_4, window_bounds = array<i64: 1, 128>}, {pipeline_mode = #tpu.pipeline_mode<synchronous>, transform_indices = @transform_5, window_bounds = array<i64: 128, 128>}, {pipeline_mode = #tpu.pipeline_mode<synchronous>, transform_indices = @transform_6, window_bounds = array<i64: 1, 128>}, {transform_indices = @transform_7, window_bounds = array<i64: 16, 128>}]} {
    %c0 = arith.constant 0 : index
    %c0_0 = arith.constant 0 : index
    %0 = vector.load %arg1[%c0, %c0_0] : memref<16x128xf32, #tpu.memory_space<vmem>>, vector<16x128xf32>
    %cst = arith.constant dense<0.000000e+00> : vector<16xf32>
    %1 = vector.multi_reduction <add>, %0, %cst [1] : vector<16x128xf32> to vector<16xf32>
    %2 = vector.shape_cast %1 : vector<16xf32> to vector<16x1xf32>
    %cst_1 = arith.constant 3.125000e-02 : f32
    %3 = vector.broadcast %cst_1 : f32 to vector<16x1xf32>
    %4 = arith.mulf %2, %3 : vector<16x1xf32>
    %5 = vector.broadcast %4 : vector<16x1xf32> to vector<16x128xf32>
    %6 = arith.subf %0, %5 : vector<16x128xf32>
    %7 = tpu.iota {dimensions = array<i32: 1>} : vector<16x128xi32>
    %c32_i32 = arith.constant 32 : i32
    %8 = vector.broadcast %c32_i32 : i32 to vector<16x128xi32>
    %9 = arith.cmpi slt, %7, %8 : vector<16x128xi32>
    %cst_2 = arith.constant 0.000000e+00 : f32
    %10 = vector.broadcast %cst_2 : f32 to vector<16x128xf32>
    %11 = arith.select %9, %6, %10 : vector<16x128xi1>, vector<16x128xf32>
    %12 = arith.mulf %11, %11 : vector<16x128xf32>
    %cst_3 = arith.constant dense<0.000000e+00> : vector<16xf32>
    %13 = vector.multi_reduction <add>, %12, %cst_3 [1] : vector<16x128xf32> to vector<16xf32>
    %14 = vector.shape_cast %13 : vector<16xf32> to vector<16x1xf32>
    %cst_4 = arith.constant 3.125000e-02 : f32
    %15 = vector.broadcast %cst_4 : f32 to vector<16x1xf32>
    %16 = arith.mulf %14, %15 : vector<16x1xf32>
    %cst_5 = arith.constant 9.99999974E-6 : f32
    %17 = vector.broadcast %cst_5 : f32 to vector<16x1xf32>
    %18 = arith.addf %16, %17 : vector<16x1xf32>
    %19 = math.rsqrt %18 : vector<16x1xf32>
    %20 = vector.broadcast %19 : vector<16x1xf32> to vector<16x128xf32>
    %21 = arith.mulf %11, %20 : vector<16x128xf32>
    %c0_6 = arith.constant 0 : index
    %c0_7 = arith.constant 0 : index
    %22 = vector.load %arg2[%c0_6, %c0_7] : memref<1x128xf32, #tpu.memory_space<vmem>>, vector<1x128xf32>
    %23 = vector.broadcast %22 : vector<1x128xf32> to vector<16x128xf32>
    %24 = arith.mulf %21, %23 : vector<16x128xf32>
    %c0_8 = arith.constant 0 : index
    %c0_9 = arith.constant 0 : index
    %25 = vector.load %arg3[%c0_8, %c0_9] : memref<1x128xf32, #tpu.memory_space<vmem>>, vector<1x128xf32>
    %26 = vector.broadcast %25 : vector<1x128xf32> to vector<16x128xf32>
    %27 = arith.addf %24, %26 : vector<16x128xf32>
    %28 = arith.truncf %27 : vector<16x128xf32> to vector<16x128xbf16>
    %c0_10 = arith.constant 0 : index
    %c0_11 = arith.constant 0 : index
    %29 = vector.load %arg4[%c0_10, %c0_11] : memref<128x128xbf16, #tpu.memory_space<vmem>>, vector<128x128xbf16>
    %cst_12 = arith.constant dense<0.000000e+00> : vector<16x128xf32>
    %30 = tpu.matmul %28, %29, %cst_12 {dimension_numbers = #tpu.dot_dimension_numbers<[1], [0], [0], [1], [0, 0, 1, 1], [], []>} : vector<16x128xbf16>, vector<128x128xbf16>, vector<16x128xf32> -> vector<16x128xf32>
    %c0_13 = arith.constant 0 : index
    %c0_14 = arith.constant 0 : index
    %31 = vector.load %arg5[%c0_13, %c0_14] : memref<1x128xf32, #tpu.memory_space<vmem>>, vector<1x128xf32>
    %32 = vector.broadcast %31 : vector<1x128xf32> to vector<16x128xf32>
    %33 = arith.addf %30, %32 : vector<16x128xf32>
    %34 = arith.negf %33 : vector<16x128xf32>
    %35 = math.exp %34 : vector<16x128xf32>
    %cst_15 = arith.constant 1.000000e+00 : f32
    %36 = vector.broadcast %cst_15 : f32 to vector<16x128xf32>
    %37 = arith.addf %36, %35 : vector<16x128xf32>
    %38 = arith.divf %36, %37 : vector<16x128xf32>
    %39 = arith.mulf %33, %38 : vector<16x128xf32>
    %40 = arith.truncf %39 : vector<16x128xf32> to vector<16x128xbf16>
    %c0_16 = arith.constant 0 : index
    %c0_17 = arith.constant 0 : index
    %41 = vector.load %arg6[%c0_16, %c0_17] : memref<128x128xbf16, #tpu.memory_space<vmem>>, vector<128x128xbf16>
    %cst_18 = arith.constant dense<0.000000e+00> : vector<16x128xf32>
    %42 = tpu.matmul %40, %41, %cst_18 {dimension_numbers = #tpu.dot_dimension_numbers<[1], [0], [0], [1], [0, 0, 1, 1], [], []>} : vector<16x128xbf16>, vector<128x128xbf16>, vector<16x128xf32> -> vector<16x128xf32>
    %c0_19 = arith.constant 0 : index
    %c0_20 = arith.constant 0 : index
    %43 = vector.load %arg7[%c0_19, %c0_20] : memref<1x128xf32, #tpu.memory_space<vmem>>, vector<1x128xf32>
    %44 = vector.broadcast %43 : vector<1x128xf32> to vector<16x128xf32>
    %45 = arith.addf %42, %44 : vector<16x128xf32>
    %c0_21 = arith.constant 0 : index
    %c0_22 = arith.constant 0 : index
    %46 = vector.load %arg8[%c0_21, %c0_22] : memref<16x128xf32, #tpu.memory_space<vmem>>, vector<16x128xf32>
    tpu.vector_store %arg8[%c0_21, %c0_22], %45 {strides = array<i32>} : memref<16x128xf32, #tpu.memory_space<vmem>>, vector<16x128xf32>,
    return
  }
  func.func @transform_0(%arg0: i32) -> (i32, i32) {
    %c0_i32 = arith.constant 0 : i32
    %c0_i32_0 = arith.constant 0 : i32
    return %arg0, %c0_i32 : i32, i32
  }
  func.func @transform_1(%arg0: i32) -> (i32, i32) {
    %c0_i32 = arith.constant 0 : i32
    %c0_i32_0 = arith.constant 0 : i32
    %c0_i32_1 = arith.constant 0 : i32
    return %c0_i32, %c0_i32_0 : i32, i32
  }
  func.func @transform_2(%arg0: i32) -> (i32, i32) {
    %c0_i32 = arith.constant 0 : i32
    %c0_i32_0 = arith.constant 0 : i32
    %c0_i32_1 = arith.constant 0 : i32
    return %c0_i32, %c0_i32_0 : i32, i32
  }
  func.func @transform_3(%arg0: i32) -> (i32, i32) {
    %c0_i32 = arith.constant 0 : i32
    %c0_i32_0 = arith.constant 0 : i32
    %c0_i32_1 = arith.constant 0 : i32
    return %c0_i32, %c0_i32_0 : i32, i32
  }
  func.func @transform_4(%arg0: i32) -> (i32, i32) {
    %c0_i32 = arith.constant 0 : i32
    %c0_i32_0 = arith.constant 0 : i32
    %c0_i32_1 = arith.constant 0 : i32
    return %c0_i32, %c0_i32_0 : i32, i32
  }
  func.func @transform_5(%arg0: i32) -> (i32, i32) {
    %c0_i32 = arith.constant 0 : i32
    %c0_i32_0 = arith.constant 0 : i32
    %c0_i32_1 = arith.constant 0 : i32
    return %c0_i32, %c0_i32_0 : i32, i32
  }
  func.func @transform_6(%arg0: i32) -> (i32, i32) {
    %c0_i32 = arith.constant 0 : i32
    %c0_i32_0 = arith.constant 0 : i32
    %c0_i32_1 = arith.constant 0 : i32
    return %c0_i32, %c0_i32_0 : i32, i32
  }
  func.func @transform_7(%arg0: i32) -> (i32, i32) {
    %c0_i32 = arith.constant 0 : i32
    %c0_i32_0 = arith.constant 0 : i32
    return %arg0, %c0_i32 : i32, i32
  }
}

</mosaic_0001>

<bundles_post_ra>
// kernel: tpu_custom_call.1
= control target key start
LH: loop header
LB: loop body
LE: loop exit
PB: predicated region body
PF: predicated region fallthrough
CT: control target
= control target key end

     0   :  { %12 = vsyncpa [#allocation3], 0  ;;  %s678_s0 = inlined_call_operand.hbm [shape: f32[16,128], index: 0, kind: input, shape index: {}]   ;;  %s679_s1 = inlined_call_operand.vmem [shape: f32[1,128], index: 1, kind: input, shape index: {}]   ;;  %s680_s2 = inlined_call_operand.vmem [shape: f32[1,128], index: 2, kind: input, shape index: {}]   ;;  %s681_s3 = inlined_call_operand.hbm [shape: bf16[128,128], index: 3, kind: input, shape index: {}]   ;;  %s682_s4 = inlined_call_operand.vmem [shape: f32[1,128], index: 4, kind: input, shape index: {}]   ;;  %s683_s5 = inlined_call_operand.hbm [shape: bf16[128,128], index: 5, kind: input, shape index: {}]   ;;  %s684_s6 = inlined_call_operand.vmem [shape: f32[1,128], index: 6, kind: input, shape index: {}]   ;;  %s685_s7 = inlined_call_operand.hbm [shape: f32[16,128], index: 7, kind: output, shape index: {}]  }
   0x1   :  { %13 = vsyncpa [#allocation6], 0 }
   0x2   :  { %14 = vsyncpa [#allocation4], 0  ;;  %s580_s24 = smov [#allocation5]  }
   0x3   :  { %s36_s25 = sshll.u32 %s580_s24, 4  ;;  %s37_s25 = int_to_ptr.vmem [resolvable:$true] %s36_s25 }
   0x4   :  { %s502_s26 = scalar_lea.vmem %s37_s25, 1024  ;;  %p507_p1 = scmp.lt.s32.totalorder %s37_s25, %s37_s25 }
   0x5   :  { %p503_p0 = scmp.ne.s32.totalorder %s37_s25, %s502_s26  ;;  %p508_p2 = scmp.lt.s32.totalorder %s502_s26, %s502_s26 }
   0x7   :  { %p509_p3 = por %p508_p2, %p507_p1 }
   0x9   :  { %p510_p4 = pnand %p509_p3, %p503_p0 }
   0xb   :  { %513 = shalt.err (!%p510_p4)
}
   0xc   :  { %s581_s27 = smov 64   ;;  %s582_s28 = smov 4  }
   0xd   :  { %42 = dma.hbm_to_vmem [thread:$0]  %s681_s3, 1024, %s37_s25, [#allocation6], %s581_s27, %s581_s27, %s582_s28  }
   0xe   :  { %s583_s8 = smov [#allocation2]  }
   0xf   :  { %s20_s9 = sshll.u32 %s583_s8, 4  ;;  %s21_s9 = int_to_ptr.vmem [resolvable:$true] %s20_s9 }
  0x10   :  { %s522_s10 = scalar_lea.vmem %s21_s9, 256  ;;  %p527_p6 = scmp.lt.s32.totalorder %s21_s9, %s21_s9 }
  0x11   :  { %p523_p5 = scmp.ne.s32.totalorder %s21_s9, %s522_s10  ;;  %p528_p7 = scmp.lt.s32.totalorder %s522_s10, %s522_s10 }
  0x13   :  { %p529_p8 = por %p528_p7, %p527_p6 }
  0x15   :  { %p530_p9 = pnand %p529_p8, %p523_p5 }
  0x17   :  { %533 = shalt.err (!%p530_p9)
}
  0x18   :  { %s584_s11 = smov 128   ;;  %s585_s12 = smov 8  }
  0x19   :  { %26 = dma.hbm_to_vmem [thread:$0]  %s678_s0, 256, %s21_s9, [#allocation3], %s584_s11, %s584_s11, %s585_s12  }
  0x1a   :  { %s586_s3 = smov [#allocation7]  }
  0x1b   :  { %s50_s15 = sshll.u32 %s586_s3, 4  ;;  %s51_s15 = int_to_ptr.vmem [resolvable:$true] %s50_s15 }
  0x1c   :  { %s542_s16 = scalar_lea.vmem %s51_s15, 1024  ;;  %p547_p11 = scmp.lt.s32.totalorder %s51_s15, %s51_s15 }
  0x1d   :  { %p543_p10 = scmp.ne.s32.totalorder %s51_s15, %s542_s16  ;;  %p548_p12 = scmp.lt.s32.totalorder %s542_s16, %s542_s16 }
  0x1f   :  { %p549_p13 = por %p548_p12, %p547_p11 }
  0x21   :  { %p550_p0 = pnand %p549_p13, %p543_p10 }
  0x23   :  { %553 = shalt.err (!%p550_p0)
}
  0x24   :  { %56 = dma.hbm_to_vmem [thread:$0]  %s683_s5, 1024, %s51_s15, [#allocation6], %s581_s27, %s581_s27, %s582_s28  }
  0x25   :  { %574 = dma.done.wait [#allocation3], 256  }
  0x26   :  { %575 = vsyncadd [#allocation3], 4294967040 }
  0x27   :  { %576 = dma.done.wait [#allocation6], 2048  }
  0x28   :  { %577 = vsyncadd [#allocation6], 4294965248  ;;  %v69_v0 = vld [vmem:[#allocation2] sm:$0xff]  ;;  %v70_v1 = vld [vmem:[#allocation2 + $0x8] sm:$0xff]  ;;  %v587_v3 = vmov 0.0   ;;  %v79_v4 = vlaneseq  ;;  %vm588_vm1 = vmmov 0  }
  0x29   :  { %71 = vadd.xlane.f32.xlu0 %v69_v0  ;;  %v466_v2 = vld [vmem:[#allocation5 + $0x38] sm:$0xff]   ;;  %416 = vmatprep.subr.bf16.mxu0 %v587_v3  ;;  %v467_v16 = vld [vmem:[#allocation5 + $0x30] sm:$0xff]   ;;  %v468_v17 = vld [vmem:[#allocation5 + $0x28] sm:$0xff]   ;;  %s589_s22 = smov [#allocation8]  }
  0x2a   :  { %436 = vmatprep.subr.bf16.mxu1 %v587_v3  ;;  %417 = vmatpush3.bf16.msra.mxu0 %v466_v2  ;;  %v80_v5 = vand.u32 127, %v79_v4  ;;  %v469_v18 = vld [vmem:[#allocation5 + $0x20] sm:$0xff]   ;;  %v470_v19 = vld [vmem:[#allocation5 + $0x18] sm:$0xff]   ;;  %v471_v20 = vld [vmem:[#allocation5 + $0x10] sm:$0xff]   ;;  %s363_s23 = sshll.u32 %s589_s22, 4  ;;  %s364_s23 = int_to_ptr.vmem [resolvable:$true] %s363_s23 }
  0x2b   :  { %418 = vmatprep.subr.bf16.mxu0 %v587_v3  ;;  %432 = vmatprep.mubr.msk.bf16.mxu0 %vm588_vm1, %v587_v3  ;;  %v472_v21 = vld [vmem:[#allocation5 + $0x8] sm:$0xff]   ;;  %v473_v22 = vld [vmem:[#allocation5] sm:$0xff]   ;;  %v376_v31 = vld [vmem:[%s679_s1] ss:$0 sm:$0xff]  ;;  %s554_s24 = scalar_lea.vmem %s364_s23, 256  ;;  %p559_p2 = scmp.lt.s32.totalorder %s364_s23, %s364_s23 }
  0x2c   :  { %vm81_vm0 = vcmp.lt.s32.totalorder %v80_v5, 32  ;;  %452 = vmatprep.mubr.msk.bf16.mxu1 %vm588_vm1, %v587_v3  ;;  %v377_v35 = vld [vmem:[%s680_s2] ss:$0 sm:$0xff]  ;;  %v474_v40 = vld [vmem:[#allocation7 + $0x38] sm:$0xff]   ;;  %v476_v42 = vld [vmem:[#allocation7 + $0x28] sm:$0xff]   ;;  %p555_p1 = scmp.ne.s32.totalorder %s364_s23, %s554_s24  ;;  %p560_p3 = scmp.lt.s32.totalorder %s554_s24, %s554_s24 }
  0x2d   :  { %73 = vadd.xlane.f32.xlu0 %v70_v1  ;;  %437 = vmatpush3.bf16.msra.mxu1 %v474_v40  ;;  %v475_v41 = vld [vmem:[#allocation7 + $0x30] sm:$0xff]   ;;  %v477_v43 = vld [vmem:[#allocation7 + $0x20] sm:$0xff]   ;;  %v478_v44 = vld [vmem:[#allocation7 + $0x18] sm:$0xff]  }
  0x2e   :  { %419 = vmatpush3.bf16.msra.mxu0 %v467_v16  ;;  %438 = vmatprep.subr.bf16.mxu1 %v587_v3  ;;  %v479_v45 = vld [vmem:[#allocation7 + $0x10] sm:$0xff]   ;;  %v480_v46 = vld [vmem:[#allocation7 + $0x8] sm:$0xff]   ;;  %v481_v47 = vld [vmem:[#allocation7] sm:$0xff]   ;;  %p561_p4 = por %p560_p3, %p559_p2 }
  0x2f   :  { %420 = vmatprep.subr.bf16.mxu0 %v587_v3  ;;  %v378_v48 = vld [vmem:[%s682_s4] ss:$0 sm:$0xff] }
  0x30   :  { %v389_v2 = vld [vmem:[%s684_s6] ss:$0 sm:$0xff]  ;;  %p562_p5 = pnand %p561_p4, %p555_p1 }
  0x31   :  { %439 = vmatpush3.bf16.msra.mxu1 %v475_v41 }
  0x32   :  { %421 = vmatpush3.bf16.msra.mxu0 %v468_v17  ;;  %440 = vmatprep.subr.bf16.mxu1 %v587_v3 }
  0x33   :  { %422 = vmatprep.subr.bf16.mxu0 %v587_v3 }
  0x35   :  { %441 = vmatpush3.bf16.msra.mxu1 %v476_v42 }
  0x36   :  { %423 = vmatpush3.bf16.msra.mxu0 %v469_v18  ;;  %442 = vmatprep.subr.bf16.mxu1 %v587_v3 }
  0x37   :  { %424 = vmatprep.subr.bf16.mxu0 %v587_v3 }
  0x39   :  { %443 = vmatpush3.bf16.msra.mxu1 %v477_v43 }
  0x3a   :  { %425 = vmatpush3.bf16.msra.mxu0 %v470_v19  ;;  %444 = vmatprep.subr.bf16.mxu1 %v587_v3 }
  0x3b   :  { %426 = vmatprep.subr.bf16.mxu0 %v587_v3 }
  0x3d   :  { %445 = vmatpush3.bf16.msra.mxu1 %v478_v44 }
  0x3e   :  { %427 = vmatpush3.bf16.msra.mxu0 %v471_v20  ;;  %446 = vmatprep.subr.bf16.mxu1 %v587_v3 }
  0x3f   :  { %428 = vmatprep.subr.bf16.mxu0 %v587_v3 }
  0x41   :  { %447 = vmatpush3.bf16.msra.mxu1 %v479_v45 }
  0x42   :  { %429 = vmatpush3.bf16.msra.mxu0 %v472_v21  ;;  %448 = vmatprep.subr.bf16.mxu1 %v587_v3 }
  0x43   :  { %430 = vmatprep.subr.bf16.mxu0 %v587_v3 }
  0x45   :  { %449 = vmatpush3.bf16.msra.mxu1 %v480_v46 }
  0x46   :  { %431 = vmatpush3.bf16.msra.mxu0 %v473_v22  ;;  %450 = vmatprep.subr.bf16.mxu1 %v587_v3 }
  0x49   :  { %451 = vmatpush3.bf16.msra.mxu1 %v481_v47 }
  0xb2   :  { %v72_v6 = vpop.xlane.xlu0 %71 }
  0xb3   :  { %v75_v7 = vmul.f32 0.03125, %v72_v6 }
  0xb5   :  { %v77_v8 = vsub.f32 %v69_v0, %v75_v7 }
  0xb6   :  { %v74_v9 = vpop.xlane.xlu0 %73 }
  0xb7   :  { %v76_v10 = vmul.f32 0.03125, %v74_v9  ;;  %v82_v11 = vsel %vm81_vm0, %v77_v8, 0.0 }
  0xb8   :  { %v84_v12 = vmul.f32 %v82_v11, %v82_v11 }
  0xb9   :  { %v78_v13 = vsub.f32 %v70_v1, %v76_v10 }
  0xba   :  { %86 = vadd.xlane.f32.xlu1 %v84_v12 }
  0xbb   :  { %v83_v14 = vsel %vm81_vm0, %v78_v13, 0.0 }
  0xbc   :  { %v85_v15 = vmul.f32 %v83_v14, %v83_v14 }
  0xbe   :  { %88 = vadd.xlane.f32.xlu1 %v85_v15 }
 0x143   :  { %v87_v23 = vpop.xlane.xlu1 %86 }
 0x144   :  { %v90_v24 = vmul.f32 0.03125, %v87_v23 }
 0x146   :  { %v92_v25 = vadd.f32 1e-05, %v90_v24 }
 0x147   :  { %v89_v26 = vpop.xlane.xlu1 %88 }
 0x148   :  { %482 = vrsqrt.f32 %v92_v25  ;;  %v91_v27 = vmul.f32 0.03125, %v89_v26 }
 0x14a   :  { %v93_v28 = vadd.f32 1e-05, %v91_v27 }
 0x14c   :  { %484 = vrsqrt.f32 %v93_v28 }
 0x155   :  { %v483_v29 = vpop.eup %482 }
 0x156   :  { %v96_v30 = vmul.f32 %v483_v29, %v82_v11 }
 0x158   :  { %v105_v34 = vmul.f32 %v376_v31, %v96_v30 }
 0x159   :  { %v485_v32 = vpop.eup %484 }
 0x15a   :  { %v97_v33 = vmul.f32 %v485_v32, %v83_v14  ;;  %v114_v37 = vadd.f32 %v377_v35, %v105_v34 }
 0x15c   :  { %v106_v36 = vmul.f32 %v376_v31, %v97_v33 }
 0x15e   :  { %v115_v38 = vadd.f32 %v377_v35, %v106_v36 }
 0x160   :  { %v116_v39 = vpack.c.bf16 %v115_v38, %v114_v37 }
 0x162   :  { %433 = vmatmul.mubr.bf16.vlgmr.msra.gmra.mxu0 %v116_v39 }
 0x222   :  { %v222_v49 = vpop.f32.mrf.mxu0 }
 0x223   :  { %v223_v50 = vadd.f32 %v378_v48, %v222_v49 }
 0x224   :  { %v434_v51 = vpop.f32.mrf.mxu0 }
 0x225   :  { %v387_v52 = vmul.f32 -1.442695, %v223_v50 }
 0x226   :  { %v225_v53 = vpop.f32.mrf.mxu0 }
 0x227   :  { %486 = vpow2.f32 %v387_v52  ;;  %v226_v54 = vadd.f32 %v378_v48, %v225_v53 }
 0x228   :  { %v435_v55 = vpop.f32.mrf.mxu0 }
 0x229   :  { %v388_v56 = vmul.f32 -1.442695, %v226_v54 }
 0x22b   :  { %488 = vpow2.f32 %v388_v56 }
 0x234   :  { %v487_v57 = vpop.eup %486 }
 0x235   :  { %v235_v58 = vadd.f32 1.0, %v487_v57 }
 0x237   :  { %490 = vrcp.f32 %v235_v58 }
 0x238   :  { %v489_v59 = vpop.eup %488 }
 0x239   :  { %v236_v60 = vadd.f32 1.0, %v489_v59 }
 0x23b   :  { %492 = vrcp.f32 %v236_v60 }
 0x244   :  { %v491_v61 = vpop.eup %490 }
 0x245   :  { %v241_v63 = vmul.f32 %v491_v61, %v223_v50 }
 0x248   :  { %v493_v62 = vpop.eup %492 }
 0x249   :  { %v242_v0 = vmul.f32 %v493_v62, %v226_v54 }
 0x24b   :  { %v243_v1 = vpack.c.bf16 %v242_v0, %v241_v63 }
 0x24d   :  { %453 = vmatmul.mubr.bf16.vlgmr.msra.gmra.mxu1 %v243_v1 }
 0x30d   :  { %v349_v3 = vpop.f32.mrf.mxu1 }
 0x30e   :  { %v350_v4 = vadd.f32 %v389_v2, %v349_v3 }
 0x30f   :  { %v454_v5 = vpop.f32.mrf.mxu1 }
 0x310   :  { %356 = vst [vmem:[#allocation8] sm:$0xff] %v350_v4 }
 0x311   :  { %v352_v6 = vpop.f32.mrf.mxu1 }
 0x312   :  { %v353_v7 = vadd.f32 %v389_v2, %v352_v6 }
 0x313   :  { %v455_v8 = vpop.f32.mrf.mxu1 }
 0x314   :  { %357 = vst [vmem:[#allocation8 + $0x8] sm:$0xff] %v353_v7 }
 0x315   :  { %565 = shalt.err (!%p562_p5)
}
 0x316   :  { %369 = dma.vmem_to_hbm [thread:$0]  %s364_s23, 256, %s685_s7, [#allocation4], %s584_s11, %s584_s11, %s585_s12  }
 0x317   :  { %578 = dma.done.wait [#allocation4], 256  }
 0x318   :  { %579 = vsyncadd [#allocation4], 4294967040 }
 0x319   :  { %373 = vsyncpa [#allocation3], 1 }
 0x31a   :  { %374 = vsyncpa [#allocation6], 1 }
 0x31b   :  { %375 = vsyncpa [#allocation4], 1 }

</bundles_post_ra>
